<compile_context>
chip_gen: v7x
topology: tpu7x:2x2x1
jax: 0.10.0
libtpu: 0.0.40
codegen_flags: <defaults>
</compile_context>

<pallas_src>
import jax
import jax.numpy as jnp
from jax.experimental import pallas as pl
from jax.experimental.pallas import tpu as pltpu

LANE = 128


# ------------------------------ small helpers ---------------------------------
def _round_up(x, m):
    return ((x + m - 1) // m) * m


def _pad2d(x, rows, cols):
    r, c = x.shape
    if r == rows and c == cols:
        return x
    return jnp.pad(x, ((0, rows - r), (0, cols - c)))


def _pad_nodes(n):
    # small graphs: pad to 128; otherwise pad to 256 so tiles never collapse to 128
    if n <= 256:
        return _round_up(n, 128)
    return _round_up(n, 256)


def _largest_div_tile(dim, cap):
    """Largest multiple of 128 that divides dim (dim % 128 == 0) and is <= cap."""
    t = min(dim, max((cap // 128) * 128, 128))
    while dim % t:
        t -= 128
    return t


def _row_tile(n_pad, cap=1024):
    # guarantee >= 2 blocks on the parallel axis when possible (v7x: 2 TensorCores)
    if n_pad <= 256:
        return n_pad
    return _largest_div_tile(n_pad, min(cap, n_pad // 2))


def _red_tile(n_pad, cap=1024):
    return _largest_div_tile(n_pad, cap)


def _block_spec(shape, index_map, buffers=None):
    """BlockSpec with optional deeper pipelining (ignored on older APIs)."""
    if buffers is not None and buffers > 2 and hasattr(pl, "Buffered"):
        try:
            return pl.BlockSpec(shape, index_map, pipeline_mode=pl.Buffered(buffers))
        except TypeError:
            pass
    return pl.BlockSpec(shape, index_map)


def _compiler_params(semantics, vmem_est):
    # request the real footprint + headroom, never the whole physical VMEM (v7x: 64 MiB)
    limit = int(min(max(vmem_est + (8 << 20), 16 << 20), 48 << 20))
    return pltpu.CompilerParams(dimension_semantics=semantics,
                                vmem_limit_bytes=limit)


# ------------------------------ Pallas kernels ---------------------------------
def _gcn_fused_kernel(kb_ref, kc_ref, a_ref, h_ref, w_ref, b_ref, o_ref, acc_ref):
    """relu((A @ H) @ W + b): aggregation accumulated in VMEM, transform + bias +
    ReLU fused into the k == last finalize.  Zero A blocks are gated out."""
    i = pl.program_id(0)
    k = pl.program_id(1)

    @pl.when(k == 0)
    def _init():
        acc_ref[...] = jnp.zeros_like(acc_ref)

    @pl.when(k < kc_ref[i])
    def _accumulate():
        acc_ref[...] += jnp.dot(a_ref[...], h_ref[...],
                                preferred_element_type=jnp.float32)

    @pl.when(k == pl.num_programs(1) - 1)
    def _finalize():
        z = jnp.dot(acc_ref[...].astype(jnp.bfloat16), w_ref[...],
                    preferred_element_type=jnp.float32)
        o_ref[...] = jnp.maximum(z + b_ref[...], 0.0).astype(o_ref.dtype)


def _agg_bias_relu_kernel(kb_ref, kc_ref, a_ref, x_ref, b_ref, o_ref, acc_ref):
    """relu(A @ X + b) with zero-block gating (used on the transform-first path)."""
    i = pl.program_id(0)
    k = pl.program_id(1)

    @pl.when(k == 0)
    def _init():
        acc_ref[...] = jnp.zeros_like(acc_ref)

    @pl.when(k < kc_ref[i])
    def _accumulate():
        acc_ref[...] += jnp.dot(a_ref[...], x_ref[...],
                                preferred_element_type=jnp.float32)

    @pl.when(k == pl.num_programs(1) - 1)
    def _finalize():
        o_ref[...] = jnp.maximum(acc_ref[...] + b_ref[...], 0.0).astype(o_ref.dtype)


def _mm_kernel(a_ref, b_ref, o_ref, acc_ref):
    """Plain tiled matmul with f32 accumulator (used for the small H @ W)."""
    @pl.when(pl.program_id(2) == 0)
    def _init():
        acc_ref[...] = jnp.zeros_like(acc_ref)

    acc_ref[...] += jnp.dot(a_ref[...], b_ref[...],
                            preferred_element_type=jnp.float32)

    @pl.when(pl.program_id(2) == pl.num_programs(2) - 1)
    def _fin():
        o_ref[...] = acc_ref[...].astype(o_ref.dtype)


# ------------------------------ pallas wrappers ---------------------------------
def _gcn_fused(a_pad, h_pad, w_pad, bias2d, kblocks, kcount, tm, tk, nbuf, out_dtype):
    n_pad = a_pad.shape[0]
    f_in = h_pad.shape[1]
    f_out = w_pad.shape[1]
    gi, gk = n_pad // tm, n_pad // tk
    out_isz = jnp.dtype(out_dtype).itemsize

    vmem_est = (nbuf * tm * tk * 2 + nbuf * tk * f_in * 2 + f_in * f_out * 2
                + f_out * 4 + tm * f_in * 4 + 2 * tm * f_out * out_isz)

    a_spec = _block_spec((tm, tk), lambda i, k, kb, kc: (i, kb[i * gk + k]),
                         buffers=nbuf)
    h_spec = _block_spec((tk, f_in), lambda i, k, kb, kc: (kb[i * gk + k], 0),
                         buffers=nbuf)
    w_spec = pl.BlockSpec((f_in, f_out), lambda i, k, kb, kc: (0, 0))
    b_spec = pl.BlockSpec((1, f_out), lambda i, k, kb, kc: (0, 0))
    out_spec = pl.BlockSpec((tm, f_out), lambda i, k, kb, kc: (i, 0))

    flops = 2 * n_pad * n_pad * f_in + 2 * n_pad * f_in * f_out
    bytes_accessed = (n_pad * n_pad * 2 + gi * n_pad * f_in * 2
                      + f_in * f_out * 2 + f_out * 4 + n_pad * f_out * out_isz)

    return pl.pallas_call(
        _gcn_fused_kernel,
        out_shape=jax.ShapeDtypeStruct((n_pad, f_out), out_dtype),
        grid_spec=pltpu.PrefetchScalarGridSpec(
            num_scalar_prefetch=2,
            grid=(gi, gk),
            in_specs=[a_spec, h_spec, w_spec, b_spec],
            out_specs=out_spec,
            scratch_shapes=[pltpu.VMEM((tm, f_in), jnp.float32)],
        ),
        compiler_params=_compiler_params(("parallel", "arbitrary"), vmem_est),
        cost_estimate=pl.CostEstimate(flops=flops, transcendentals=0,
                                      bytes_accessed=bytes_accessed),
    )(kblocks, kcount, a_pad, h_pad, w_pad, bias2d)


def _agg_bias_relu(a_pad, x_pad, bias2d, kblocks, kcount, tm, tk, nbuf, out_dtype):
    n_pad = a_pad.shape[0]
    f_out = x_pad.shape[1]
    gi, gk = n_pad // tm, n_pad // tk
    out_isz = jnp.dtype(out_dtype).itemsize

    vmem_est = (nbuf * tm * tk * 2 + nbuf * tk * f_out * 2 + f_out * 4
                + tm * f_out * 4 + 2 * tm * f_out * out_isz)

    a_spec = _block_spec((tm, tk), lambda i, k, kb, kc: (i, kb[i * gk + k]),
                         buffers=nbuf)
    x_spec = _block_spec((tk, f_out), lambda i, k, kb, kc: (kb[i * gk + k], 0),
                         buffers=nbuf)
    b_spec = pl.BlockSpec((1, f_out), lambda i, k, kb, kc: (0, 0))
    out_spec = pl.BlockSpec((tm, f_out), lambda i, k, kb, kc: (i, 0))

    return pl.pallas_call(
        _agg_bias_relu_kernel,
        out_shape=jax.ShapeDtypeStruct((n_pad, f_out), out_dtype),
        grid_spec=pltpu.PrefetchScalarGridSpec(
            num_scalar_prefetch=2,
            grid=(gi, gk),
            in_specs=[a_spec, x_spec, b_spec],
            out_specs=out_spec,
            scratch_shapes=[pltpu.VMEM((tm, f_out), jnp.float32)],
        ),
        compiler_params=_compiler_params(("parallel", "arbitrary"), vmem_est),
        cost_estimate=pl.CostEstimate(
            flops=2 * n_pad * n_pad * f_out, transcendentals=0,
            bytes_accessed=n_pad * n_pad * 2 + gi * n_pad * f_out * 2
                           + n_pad * f_out * out_isz),
    )(kblocks, kcount, a_pad, x_pad, bias2d)


def _matmul(a, b, out_dtype):
    """Small tiled matmul C = a @ b (bf16 inputs, f32 accumulate)."""
    M, K = a.shape
    K2, N = b.shape
    assert K == K2, (a.shape, b.shape)
    tm = _largest_div_tile(M, 512)
    tn = _largest_div_tile(N, 512)
    tk = _largest_div_tile(K, 512)
    out_isz = jnp.dtype(out_dtype).itemsize
    vmem_est = 2 * tm * tk * 2 + 2 * tk * tn * 2 + tm * tn * 4 + 2 * tm * tn * out_isz
    return pl.pallas_call(
        _mm_kernel,
        out_shape=jax.ShapeDtypeStruct((M, N), out_dtype),
        grid_spec=pltpu.PrefetchScalarGridSpec(
            num_scalar_prefetch=0,
            grid=(M // tm, N // tn, K // tk),
            in_specs=[pl.BlockSpec((tm, tk), lambda i, j, k: (i, k)),
                      pl.BlockSpec((tk, tn), lambda i, j, k: (k, j))],
            out_specs=pl.BlockSpec((tm, tn), lambda i, j, k: (i, j)),
            scratch_shapes=[pltpu.VMEM((tm, tn), jnp.float32)],
        ),
        compiler_params=_compiler_params(("parallel", "parallel", "arbitrary"),
                                         vmem_est),
        cost_estimate=pl.CostEstimate(flops=2 * M * K * N, transcendentals=0,
                                      bytes_accessed=M * K * 2 + K * N * 2
                                                     + M * N * out_isz),
    )(a, b)


def gcn_layer(a_pad, h_pad, w_pad, bias2d, kblocks, kcount, tm, tk, nbuf, out_dtype):
    """One GCNConv + ReLU layer on padded operands."""
    f_in = h_pad.shape[1]
    f_out = w_pad.shape[1]
    if f_in <= f_out and f_in <= 512:
        # Single fused kernel: the (N, F_in) intermediate never touches HBM.
        return _gcn_fused(a_pad, h_pad, w_pad, bias2d, kblocks, kcount,
                          tm, tk, nbuf, out_dtype)
    # Wide-input layer: transform first (cheap), then fused aggregation epilogue.
    hw = _matmul(h_pad, w_pad, jnp.bfloat16)
    return _agg_bias_relu(a_pad, hw, bias2d, kblocks, kcount, tm, tk, nbuf, out_dtype)


# ------------------------------- Glue (JAX) ------------------------------------
def _normalized_adj_padded(edge_index, edge_weight, n, n_pad):
    """GCN-normalized dense adjacency, built directly at padded size in bf16
    (scatter -> degrees -> one fused N^2 scale + cast pass)."""
    # TODO(synk): densifying A is O(N^2); a true sparse gather/scatter aggregation
    # kernel would be needed to scale to very large graphs.
    src = edge_index[0]
    dst = edge_index[1]
    if edge_weight is None:
        edge_weight = jnp.ones(src.shape[0], dtype=jnp.float32)
    adj = jnp.zeros((n_pad, n_pad), dtype=jnp.float32)
    adj = adj.at[dst, src].add(edge_weight.astype(jnp.float32))   # msg src -> dst
    idx = jnp.arange(n)
    adj = adj.at[idx, idx].add(1.0)                               # self loops
    deg = jnp.sum(adj, axis=1)                                    # padded rows: 0
    dinv = jnp.where(deg > 0.0, jax.lax.rsqrt(deg), 0.0)
    return (dinv[:, None] * adj * dinv[None, :]).astype(jnp.bfloat16)


def _block_schedule(a_pad, tm, tk):
    """Per-row compacted list of nonzero (tm x tk) A blocks + counts.
    Padding slots repeat the last valid block index so the pipeline elides
    their DMAs; the kernel gates their compute with pl.when(k < kcount[i])."""
    n_pad = a_pad.shape[0]
    gi, gk = n_pad // tm, n_pad // tk
    blk = jnp.abs(a_pad.astype(jnp.float32)).reshape(gi, tm, gk, tk).sum(axis=(1, 3))
    mask = blk > 0.0
    ar = jnp.arange(gk, dtype=jnp.int32)[None, :]
    keys = jnp.where(mask, ar, ar + gk)          # nonzero blocks first, in order
    order = jnp.argsort(keys, axis=1).astype(jnp.int32)
    kcount = jnp.sum(mask, axis=1).astype(jnp.int32)   # >= 1 (self-loop diag block)
    last = jnp.take_along_axis(order, jnp.maximum(kcount - 1, 0)[:, None], axis=1)
    kblocks = jnp.where(ar < kcount[:, None], order, last).astype(jnp.int32)
    return kblocks.reshape(-1), kcount


def glorot(key, fan_in, fan_out):
    limit = jnp.sqrt(6.0 / (fan_in + fan_out))
    return jax.random.uniform(key, (fan_in, fan_out), jnp.float32, -limit, limit)


class DiGCL:
    """JAX/Pallas re-implementation of the DiGCL forward pass (== encoder)."""

    def __init__(self, key, in_channels, num_hidden, num_proj_hidden, tau,
                 num_layers, activation="relu"):
        assert num_layers >= 2
        assert activation == "relu"  # TODO(synk): prelu/rrelu activations not implemented
        self.tau = tau
        self.num_layers = num_layers
        self.num_hidden = num_hidden

        keys = jax.random.split(key, num_layers + 2)
        dims = [in_channels] + [2 * num_hidden] * (num_layers - 1) + [num_hidden]
        self.dims = dims
        self.w_pad, self.b_pad = [], []
        for i in range(num_layers):
            w = glorot(keys[i], dims[i], dims[i + 1])
            b = jnp.zeros((dims[i + 1],), jnp.float32)   # PyG GCNConv zero bias
            fi_p = _round_up(dims[i], LANE)
            fo_p = _round_up(dims[i + 1], LANE)
            self.w_pad.append(_pad2d(w, fi_p, fo_p).astype(jnp.bfloat16))
            self.b_pad.append(jnp.pad(b, (0, fo_p - dims[i + 1]))
                              .reshape(1, fo_p).astype(jnp.float32))

        # Projection head params (training-only; not part of forward()).
        self.fc1_w = glorot(keys[num_layers], num_hidden, num_proj_hidden)
        self.fc1_b = jnp.zeros((num_proj_hidden,), jnp.float32)
        self.fc2_w = glorot(keys[num_layers + 1], num_proj_hidden, num_hidden)
        self.fc2_b = jnp.zeros((num_hidden,), jnp.float32)
        # TODO(synk): projection()/sim()/semi_loss()/loss() are training-only
        # utilities, not part of forward(); not implemented as kernels.

    def __call__(self, x, edge_index, edge_weight=None):
        n, f_in = x.shape
        n_pad = _pad_nodes(n)

        # Normalized adjacency built once, padded, bf16 (single fused N^2 pass).
        a_pad = _normalized_adj_padded(edge_index, edge_weight, n, n_pad)

        # Shared aggregation tiling for every layer.
        max_f = max(_round_up(d, LANE) for d in self.dims)
        cap = 1024 if max_f <= 256 else 512
        tm = _row_tile(n_pad, cap)
        tk = _red_tile(n_pad, cap)
        gk = n_pad // tk
        nbuf = 3 if gk >= 4 else 2   # deeper input buffering for BW-bound parts

        # Block-sparsity schedule for A (scalar-prefetched into SMEM).
        kblocks, kcount = _block_schedule(a_pad, tm, tk)

        h = _pad2d(x.astype(jnp.bfloat16), n_pad, _round_up(f_in, LANE))
        for i in range(self.num_layers):
            out_dtype = jnp.float32 if i == self.num_layers - 1 else jnp.bfloat16
            h = gcn_layer(a_pad, h, self.w_pad[i], self.b_pad[i],
                          kblocks, kcount, tm, tk, nbuf, out_dtype)

        return h[:n, : self.dims[-1]]


# --------------------------------- Main -----------------------------------------
if __name__ == "__main__":
    key = jax.random.PRNGKey(0)
    k_param, k_x, k_src, k_dst, k_w = jax.random.split(key, 5)

    num_nodes = 32
    in_channels = 16
    num_hidden = 32
    num_proj_hidden = 32
    num_layers = 2
    num_edges = 96

    x = jax.random.normal(k_x, (num_nodes, in_channels), jnp.float32)
    src = jax.random.randint(k_src, (num_edges,), 0, num_nodes)
    dst = jax.random.randint(k_dst, (num_edges,), 0, num_nodes)
    edge_index = jnp.stack([src, dst], axis=0)
    edge_weight = jax.random.uniform(k_w, (num_edges,), jnp.float32, 0.1, 1.0)

    model = DiGCL(k_param, in_channels, num_hidden, num_proj_hidden,
                  tau=0.5, num_layers=num_layers, activation="relu")

    out = model(x, edge_index, edge_weight)
    out = jax.block_until_ready(out)
    assert out.shape == (num_nodes, num_hidden), out.shape
    assert out.dtype == jnp.float32
    assert bool(jnp.isfinite(out).all())
    print("KERNEL_OK")
</pallas_src>

<mosaic_0001>
module attributes {stable_mosaic.version = 11 : i64} {
  func.func @_gcn_fused_kernel(%arg0: i32, %arg1: i32, %arg2: memref<1xi32, #tpu.memory_space<smem>>, %arg3: memref<1xi32, #tpu.memory_space<smem>>, %arg4: memref<128x128xbf16, #tpu.memory_space<vmem>>, %arg5: memref<128x128xbf16, #tpu.memory_space<vmem>>, %arg6: memref<128x128xbf16, #tpu.memory_space<vmem>>, %arg7: memref<1x128xf32, #tpu.memory_space<vmem>>, %arg8: memref<128x128xbf16, #tpu.memory_space<vmem>>, %arg9: memref<128x128xf32, #tpu.memory_space<vmem>>) attributes {dimension_semantics = [#tpu.dimension_semantics<parallel>, #tpu.dimension_semantics<arbitrary>], iteration_bounds = array<i64: 1, 1>, scalar_prefetch = 2 : i64, scratch_operands = 1 : i64, tpu.core_type = #tpu.core_type<tc>, window_params = [{transform_indices = @transform_0, window_bounds = array<i64: 128, 128>}, {transform_indices = @transform_1, window_bounds = array<i64: 128, 128>}, {pipeline_mode = #tpu.pipeline_mode<synchronous>, transform_indices = @transform_2, window_bounds = array<i64: 128, 128>}, {pipeline_mode = #tpu.pipeline_mode<synchronous>, transform_indices = @transform_3, window_bounds = array<i64: 1, 128>}, {transform_indices = @transform_4, window_bounds = array<i64: 128, 128>}]} {
    %c0_i32 = arith.constant 0 : i32
    %0 = arith.cmpi eq, %arg1, %c0_i32 : i32
    %1 = arith.extui %0 : i1 to i32
    %c0_i32_0 = arith.constant 0 : i32
    %2 = arith.cmpi ne, %1, %c0_i32_0 : i32
    scf.if %2 {
      %cst = arith.constant 0.000000e+00 : f32
      %11 = vector.broadcast %cst : f32 to vector<128x128xf32>
      %c0 = arith.constant 0 : index
      %c0_4 = arith.constant 0 : index
      %12 = vector.load %arg9[%c0, %c0_4] : memref<128x128xf32, #tpu.memory_space<vmem>>, vector<128x128xf32>
      tpu.vector_store %arg9[%c0, %c0_4], %11 {strides = array<i32>} : memref<128x128xf32, #tpu.memory_space<vmem>>, vector<128x128xf32>,
    } else {
    }
    %3 = arith.index_cast %arg0 : i32 to index
    %4 = memref.load %arg3[%3] : memref<1xi32, #tpu.memory_space<smem>>
    %5 = arith.cmpi slt, %arg1, %4 : i32
    %6 = arith.extui %5 : i1 to i32
    %c0_i32_1 = arith.constant 0 : i32
    %7 = arith.cmpi ne, %6, %c0_i32_1 : i32
    scf.if %7 {
      %c0 = arith.constant 0 : index
      %c0_4 = arith.constant 0 : index
      %11 = vector.load %arg9[%c0, %c0_4] : memref<128x128xf32, #tpu.memory_space<vmem>>, vector<128x128xf32>
      %c0_5 = arith.constant 0 : index
      %c0_6 = arith.constant 0 : index
      %12 = vector.load %arg4[%c0_5, %c0_6] : memref<128x128xbf16, #tpu.memory_space<vmem>>, vector<128x128xbf16>
      %c0_7 = arith.constant 0 : index
      %c0_8 = arith.constant 0 : index
      %13 = vector.load %arg5[%c0_7, %c0_8] : memref<128x128xbf16, #tpu.memory_space<vmem>>, vector<128x128xbf16>
      %cst = arith.constant dense<0.000000e+00> : vector<128x128xf32>
      %14 = tpu.matmul %12, %13, %cst {dimension_numbers = #tpu.dot_dimension_numbers<[1], [0], [0], [1], [0, 0, 1, 1], [], []>} : vector<128x128xbf16>, vector<128x128xbf16>, vector<128x128xf32> -> vector<128x128xf32>
      %15 = arith.addf %11, %14 : vector<128x128xf32>
      %c0_9 = arith.constant 0 : index
      %c0_10 = arith.constant 0 : index
      %16 = vector.load %arg9[%c0_9, %c0_10] : memref<128x128xf32, #tpu.memory_space<vmem>>, vector<128x128xf32>
      tpu.vector_store %arg9[%c0_9, %c0_10], %15 {strides = array<i32>} : memref<128x128xf32, #tpu.memory_space<vmem>>, vector<128x128xf32>,
    } else {
    }
    %c0_i32_2 = arith.constant 0 : i32
    %8 = arith.cmpi eq, %arg1, %c0_i32_2 : i32
    %9 = arith.extui %8 : i1 to i32
    %c0_i32_3 = arith.constant 0 : i32
    %10 = arith.cmpi ne, %9, %c0_i32_3 : i32
    scf.if %10 {
      %c0 = arith.constant 0 : index
      %c0_4 = arith.constant 0 : index
      %11 = vector.load %arg9[%c0, %c0_4] : memref<128x128xf32, #tpu.memory_space<vmem>>, vector<128x128xf32>
      %12 = arith.truncf %11 : vector<128x128xf32> to vector<128x128xbf16>
      %c0_5 = arith.constant 0 : index
      %c0_6 = arith.constant 0 : index
      %13 = vector.load %arg6[%c0_5, %c0_6] : memref<128x128xbf16, #tpu.memory_space<vmem>>, vector<128x128xbf16>
      %cst = arith.constant dense<0.000000e+00> : vector<128x128xf32>
      %14 = tpu.matmul %12, %13, %cst {dimension_numbers = #tpu.dot_dimension_numbers<[1], [0], [0], [1], [0, 0, 1, 1], [], []>} : vector<128x128xbf16>, vector<128x128xbf16>, vector<128x128xf32> -> vector<128x128xf32>
      %c0_7 = arith.constant 0 : index
      %c0_8 = arith.constant 0 : index
      %15 = vector.load %arg7[%c0_7, %c0_8] : memref<1x128xf32, #tpu.memory_space<vmem>>, vector<1x128xf32>
      %16 = vector.broadcast %15 : vector<1x128xf32> to vector<128x128xf32>
      %17 = arith.addf %14, %16 : vector<128x128xf32>
      %cst_9 = arith.constant 0.000000e+00 : f32
      %18 = vector.broadcast %cst_9 : f32 to vector<128x128xf32>
      %19 = arith.maximumf %17, %18 : vector<128x128xf32>
      %20 = arith.truncf %19 : vector<128x128xf32> to vector<128x128xbf16>
      %c0_10 = arith.constant 0 : index
      %c0_11 = arith.constant 0 : index
      %21 = vector.load %arg8[%c0_10, %c0_11] : memref<128x128xbf16, #tpu.memory_space<vmem>>, vector<128x128xbf16>
      tpu.vector_store %arg8[%c0_10, %c0_11], %20 {strides = array<i32>} : memref<128x128xbf16, #tpu.memory_space<vmem>>, vector<128x128xbf16>,
    } else {
    }
    return
  }
  func.func @transform_0(%arg0: i32, %arg1: i32, %arg2: memref<1xi32, #tpu.memory_space<smem>>, %arg3: memref<1xi32, #tpu.memory_space<smem>>) -> (i32, i32) {
    %c1_i32 = arith.constant 1 : i32
    %0 = arith.muli %arg0, %c1_i32 : i32
    %1 = arith.addi %0, %arg1 : i32
    %2 = arith.index_cast %1 : i32 to index
    %3 = memref.load %arg2[%2] : memref<1xi32, #tpu.memory_space<smem>>
    %c0_i32 = arith.constant 0 : i32
    return %arg0, %3 : i32, i32
  }
  func.func @transform_1(%arg0: i32, %arg1: i32, %arg2: memref<1xi32, #tpu.memory_space<smem>>, %arg3: memref<1xi32, #tpu.memory_space<smem>>) -> (i32, i32) {
    %c1_i32 = arith.constant 1 : i32
    %0 = arith.muli %arg0, %c1_i32 : i32
    %1 = arith.addi %0, %arg1 : i32
    %2 = arith.index_cast %1 : i32 to index
    %3 = memref.load %arg2[%2] : memref<1xi32, #tpu.memory_space<smem>>
    %c0_i32 = arith.constant 0 : i32
    %c0_i32_0 = arith.constant 0 : i32
    return %3, %c0_i32 : i32, i32
  }
  func.func @transform_2(%arg0: i32, %arg1: i32, %arg2: memref<1xi32, #tpu.memory_space<smem>>, %arg3: memref<1xi32, #tpu.memory_space<smem>>) -> (i32, i32) {
    %c0_i32 = arith.constant 0 : i32
    %c0_i32_0 = arith.constant 0 : i32
    %c0_i32_1 = arith.constant 0 : i32
    return %c0_i32, %c0_i32_0 : i32, i32
  }
  func.func @transform_3(%arg0: i32, %arg1: i32, %arg2: memref<1xi32, #tpu.memory_space<smem>>, %arg3: memref<1xi32, #tpu.memory_space<smem>>) -> (i32, i32) {
    %c0_i32 = arith.constant 0 : i32
    %c0_i32_0 = arith.constant 0 : i32
    %c0_i32_1 = arith.constant 0 : i32
    return %c0_i32, %c0_i32_0 : i32, i32
  }
  func.func @transform_4(%arg0: i32, %arg1: i32, %arg2: memref<1xi32, #tpu.memory_space<smem>>, %arg3: memref<1xi32, #tpu.memory_space<smem>>) -> (i32, i32) {
    %c0_i32 = arith.constant 0 : i32
    %c0_i32_0 = arith.constant 0 : i32
    return %arg0, %c0_i32 : i32, i32
  }
}

</mosaic_0001>

<bundles_post_ra>
// kernel: tpu_custom_call.1
= control target key start
LH: loop header
LB: loop body
LE: loop exit
PB: predicated region body
PF: predicated region fallthrough
CT: control target
= control target key end

     0   :  { %13 = vsyncpa [#allocation7], 0  ;;  %s1164_s0 = inlined_call_operand.<no memory space> [shape: s32[1], index: 0, kind: input, shape index: {}]   ;;  %s1165_s1 = inlined_call_operand.<no memory space> [shape: s32[1], index: 1, kind: input, shape index: {}]   ;;  %s1166_s2 = inlined_call_operand.hbm [shape: bf16[128,128], index: 2, kind: input, shape index: {}]   ;;  %s1167_s3 = inlined_call_operand.hbm [shape: bf16[128,128], index: 3, kind: input, shape index: {}]   ;;  %s1168_s4 = inlined_call_operand.hbm [shape: bf16[128,128], index: 4, kind: input, shape index: {}]   ;;  %s1169_s5 = inlined_call_operand.vmem [shape: f32[1,128], index: 5, kind: input, shape index: {}]   ;;  %s1170_s6 = inlined_call_operand.hbm [shape: bf16[128,128], index: 6, kind: output, shape index: {}]  }
   0x1   :  { %14 = vsyncpa [#allocation10], 0 }
   0x2   :  { %15 = vsyncpa [#allocation8], 0  ;;  %s735_s23 = sshll.u32 %s1164_s0, 10  ;;  %s1056_s27 = smov [#allocation9]  }
   0x3   :  { %s41_s26 = scalar_lea.hbm %s1167_s3, %s735_s23  ;;  %s42_s28 = sshll.u32 %s1056_s27, 4  ;;  %s43_s28 = int_to_ptr.vmem [resolvable:$true] %s42_s28 }
   0x4   :  { %s689_s7 = sshll.u32 %s1164_s0, 6  ;;  %s958_s8 = scalar_lea.hbm %s41_s26, 1024 }
   0x5   :  { %p959_p0 = scmp.ne.s32.totalorder %s41_s26, %s958_s8  ;;  %s960_s11 = scalar_lea.hbm %s1167_s3, 1024 }
   0x6   :  { %p961_p1 = scmp.lt.u32.totalorder %s41_s26, %s1167_s3  ;;  %p962_p2 = scmp.lt.u32.totalorder %s960_s11, %s958_s8 }
   0x7   :  { %p964_p4 = scmp.lt.u32.totalorder %s958_s8, %s41_s26 }
   0x8   :  { %p963_p3 = por %p962_p2, %p961_p1 }
   0xa   :  { %p965_p5 = por %p964_p4, %p963_p3 }
   0xc   :  { %p966_p6 = pnand %p965_p5, %p959_p0 }
   0xe   :  { %969 = shalt.err (!%p966_p6)
}
   0xf   :  { %s970_s14 = scalar_lea.vmem %s43_s28, 1024  ;;  %p975_p8 = scmp.lt.s32.totalorder %s43_s28, %s43_s28 }
  0x10   :  { %p971_p7 = scmp.ne.s32.totalorder %s43_s28, %s970_s14  ;;  %p976_p9 = scmp.lt.s32.totalorder %s970_s14, %s970_s14 }
  0x12   :  { %p977_p10 = por %p976_p9, %p975_p8 }
  0x14   :  { %p978_p11 = pnand %p977_p10, %p971_p7 }
  0x16   :  { %981 = shalt.err (!%p978_p11)
}
  0x17   :  { %s1057_s0 = smov 64   ;;  %s1058_s15 = smov 4  }
  0x18   :  { %48 = dma.hbm_to_vmem [thread:$0]  %s41_s26, 1024, %s43_s28, [#allocation10], %s1057_s0, %s1057_s0, %s1058_s15  }
  0x19   :  { %s24_s17 = scalar_lea.hbm %s1166_s2, %s689_s7  ;;  %s1059_s18 = smov [#allocation6]  }
  0x1a   :  { %s25_s19 = sshll.u32 %s1059_s18, 4  ;;  %s1060_s20 = smov [#allocation11]   ;;  %s26_s19 = int_to_ptr.vmem [resolvable:$true] %s25_s19 }
  0x1b   :  { %s54_s21 = sshll.u32 %s1060_s20, 4  ;;  %s982_s22 = scalar_lea.hbm %s24_s17, 1024  ;;  %s55_s21 = int_to_ptr.vmem [resolvable:$true] %s54_s21 }
  0x1c   :  { %p983_p12 = scmp.ne.s32.totalorder %s24_s17, %s982_s22  ;;  %s984_s25 = scalar_lea.hbm %s1166_s2, 1024 }
  0x1d   :  { %p985_p13 = scmp.lt.u32.totalorder %s24_s17, %s1166_s2  ;;  %p986_p0 = scmp.lt.u32.totalorder %s984_s25, %s982_s22 }
  0x1e   :  { %p988_p2 = scmp.lt.u32.totalorder %s982_s22, %s24_s17 }
  0x1f   :  { %p987_p1 = por %p986_p0, %p985_p13 }
  0x21   :  { %p989_p3 = por %p988_p2, %p987_p1 }
  0x23   :  { %p990_p4 = pnand %p989_p3, %p983_p12 }
  0x25   :  { %993 = shalt.err (!%p990_p4)
}
  0x26   :  { %s994_s26 = scalar_lea.vmem %s26_s19, 1024  ;;  %p999_p6 = scmp.lt.s32.totalorder %s26_s19, %s26_s19 }
  0x27   :  { %p995_p5 = scmp.ne.s32.totalorder %s26_s19, %s994_s26  ;;  %p1000_p7 = scmp.lt.s32.totalorder %s994_s26, %s994_s26 }
  0x29   :  { %p1001_p8 = por %p1000_p7, %p999_p6 }
  0x2b   :  { %p1002_p9 = pnand %p1001_p8, %p995_p5 }
  0x2d   :  { %1005 = shalt.err (!%p1002_p9)
}
  0x2e   :  { %31 = dma.hbm_to_vmem [thread:$0]  %s24_s17, 1024, %s26_s19, [#allocation7], %s1057_s0, %s1057_s0, %s1058_s15  }
  0x2f   :  { %s1006_s30 = scalar_lea.hbm %s1168_s4, 1024 }
  0x30   :  { %p1007_p10 = scmp.ne.s32.totalorder %s1168_s4, %s1006_s30  ;;  %p1010_p11 = scmp.lt.u32.totalorder %s1006_s30, %s1168_s4 }
  0x32   :  { %p1012_p12 = pnand %p1010_p11, %p1007_p10 }
  0x34   :  { %1015 = shalt.err (!%p1012_p12)
}
  0x35   :  { %s1016_s11 = scalar_lea.vmem %s55_s21, 1024  ;;  %p1021_p0 = scmp.lt.s32.totalorder %s55_s21, %s55_s21 }
  0x36   :  { %p1017_p13 = scmp.ne.s32.totalorder %s55_s21, %s1016_s11  ;;  %p1022_p1 = scmp.lt.s32.totalorder %s1016_s11, %s1016_s11 }
  0x38   :  { %p1023_p2 = por %p1022_p1, %p1021_p0 }
  0x3a   :  { %p1024_p3 = pnand %p1023_p2, %p1017_p13 }
  0x3c   :  { %1027 = shalt.err (!%p1024_p3)
}
  0x3d   :  { %60 = dma.hbm_to_vmem [thread:$0]  %s1168_s4, 1024, %s55_s21, [#allocation10], %s1057_s0, %s1057_s0, %s1058_s15  }
  0x3e   :  { %1050 = dma.done.wait [#allocation7], 1024  }
  0x3f   :  { %1051 = vsyncadd [#allocation7], 4294966272 }
  0x40   :  { %1052 = dma.done.wait [#allocation10], 2048  }
  0x41   :  { %1053 = vsyncadd [#allocation10], 4294965248  ;;  %v1061_v0 = vmov 0.0   ;;  %p693_p4 = scmp.le.s32.totalorder %s1165_s1, 0 }
  0x42   :  { %82 = vst [vmem:[#allocation2] sm:$0xff] %v1061_v0  ;;  %83 = vst [vmem:[#allocation2 + $0x8] sm:$0xff] %v1061_v0  ;;  %v934_v1 = vld [vmem:[#allocation9] sm:$0xff] (!%p693_p4)   ;;  %v935_v2 = vld [vmem:[#allocation9 + $0x8] sm:$0xff] (!%p693_p4)  }
  0x43   :  { %84 = vst [vmem:[#allocation2 + $0x10] sm:$0xff] %v1061_v0  ;;  %85 = vst [vmem:[#allocation2 + $0x18] sm:$0xff] %v1061_v0  ;;  %102 = sbr.rel (%p693_p4) target bundleno = 325 (0x145), region = 37  ;;  %831 = vmatprep.subr.bf16.mxu0 (!%p693_p4), %v934_v1  ;;  %895 = vmatprep.subr.bf16.mxu1 (!%p693_p4), %v934_v1  ;;  %v936_v3 = vld [vmem:[#allocation9 + $0x10] sm:$0xff] (!%p693_p4)   ;;  %v937_v4 = vld [vmem:[#allocation9 + $0x18] sm:$0xff] (!%p693_p4)  }
  0x44   :  { %86 = vst [vmem:[#allocation2 + $0x20] sm:$0xff] %v1061_v0  ;;  %87 = vst [vmem:[#allocation2 + $0x28] sm:$0xff] %v1061_v0  ;;  %832 = vmatpush3.bf16.msra.mxu0 (!%p693_p4), %v934_v1  ;;  %903 = vmatpush3.bf16.msra.mxu1 (!%p693_p4), %v934_v1  ;;  %v942_v5 = vld [vmem:[#allocation6] sm:$0xff] (!%p693_p4)   ;;  %v939_v8 = vld [vmem:[#allocation9 + $0x28] sm:$0xff] (!%p693_p4)  }
  0x45   :  { %88 = vst [vmem:[#allocation2 + $0x30] sm:$0xff] %v1061_v0  ;;  %89 = vst [vmem:[#allocation2 + $0x38] sm:$0xff] %v1061_v0  ;;  %833 = vmatprep.subr.bf16.mxu0 (!%p693_p4), %v935_v2  ;;  %896 = vmatprep.subr.bf16.mxu1 (!%p693_p4), %v935_v2  ;;  %v943_v6 = vld [vmem:[#allocation6 + $0x20] sm:$0xff] (!%p693_p4)   ;;  %v940_v9 = vld [vmem:[#allocation9 + $0x30] sm:$0xff] (!%p693_p4)  }
  0x46   :  { %90 = vst [vmem:[#allocation2 + $0x40] sm:$0xff] %v1061_v0  ;;  %91 = vst [vmem:[#allocation2 + $0x48] sm:$0xff] %v1061_v0  ;;  %847 = vmatprep.mubr.bf16.mxu0 (!%p693_p4), %v942_v5  ;;  %v938_v7 = vld [vmem:[#allocation9 + $0x20] sm:$0xff] (!%p693_p4)   ;;  %855 = vmatprep.mubr.bf16.mxu1 (!%p693_p4), %v943_v6  ;;  %v941_v10 = vld [vmem:[#allocation9 + $0x38] sm:$0xff] (!%p693_p4)  }
  0x47   :  { %92 = vst [vmem:[#allocation2 + $0x50] sm:$0xff] %v1061_v0  ;;  %93 = vst [vmem:[#allocation2 + $0x58] sm:$0xff] %v1061_v0  ;;  %v944_v11 = vld [vmem:[#allocation6 + $0x8] sm:$0xff] (!%p693_p4)   ;;  %v946_v13 = vld [vmem:[#allocation6 + $0x10] sm:$0xff] (!%p693_p4)  }
  0x48   :  { %94 = vst [vmem:[#allocation2 + $0x60] sm:$0xff] %v1061_v0  ;;  %95 = vst [vmem:[#allocation2 + $0x68] sm:$0xff] %v1061_v0  ;;  %834 = vmatpush3.bf16.msra.mxu0 (!%p693_p4), %v935_v2  ;;  %904 = vmatpush3.bf16.msra.mxu1 (!%p693_p4), %v935_v2  ;;  %v945_v12 = vld [vmem:[#allocation6 + $0x28] sm:$0xff] (!%p693_p4)   ;;  %v947_v14 = vld [vmem:[#allocation6 + $0x30] sm:$0xff] (!%p693_p4)  }
  0x49   :  { %96 = vst [vmem:[#allocation2 + $0x70] sm:$0xff] %v1061_v0  ;;  %97 = vst [vmem:[#allocation2 + $0x78] sm:$0xff] %v1061_v0  ;;  %835 = vmatprep.subr.bf16.mxu0 (!%p693_p4), %v936_v3  ;;  %897 = vmatprep.subr.bf16.mxu1 (!%p693_p4), %v936_v3  ;;  %v948_v15 = vld [vmem:[#allocation6 + $0x18] sm:$0xff] (!%p693_p4)   ;;  %v103_v19 = vld [vmem:[#allocation2] sm:$0xff] (!%p693_p4) }
  0x4a   :  { %v949_v16 = vld [vmem:[#allocation6 + $0x38] sm:$0xff]   ;;  %v105_v17 = vld [vmem:[#allocation2 + $0x10] sm:$0xff]  ;;  %v104_v29 = vld [vmem:[#allocation2 + $0x8] sm:$0xff] }
  0x4b   :  { %v106_v23 = vld [vmem:[#allocation2 + $0x18] sm:$0xff]  ;;  %v107_v43 = vld [vmem:[#allocation2 + $0x20] sm:$0xff]  ;;  %v108_v53 = vld [vmem:[#allocation2 + $0x28] sm:$0xff] }
  0x4c   :  { %836 = vmatpush3.bf16.msra.mxu0 %v936_v3  ;;  %905 = vmatpush3.bf16.msra.mxu1 %v936_v3  ;;  %v109_v41 = vld [vmem:[#allocation2 + $0x30] sm:$0xff]  ;;  %v110_v47 = vld [vmem:[#allocation2 + $0x38] sm:$0xff] }
  0x4d   :  { %837 = vmatprep.subr.bf16.mxu0 %v937_v4  ;;  %898 = vmatprep.subr.bf16.mxu1 %v937_v4  ;;  %v111_v20 = vld [vmem:[#allocation2 + $0x40] sm:$0xff]  ;;  %v112_v30 = vld [vmem:[#allocation2 + $0x48] sm:$0xff] }
  0x4e   :  { %v113_v18 = vld [vmem:[#allocation2 + $0x50] sm:$0xff]  ;;  %v114_v24 = vld [vmem:[#allocation2 + $0x58] sm:$0xff] }
  0x4f   :  { %v115_v44 = vld [vmem:[#allocation2 + $0x60] sm:$0xff]  ;;  %v116_v54 = vld [vmem:[#allocation2 + $0x68] sm:$0xff] }
  0x50   :  { %838 = vmatpush3.bf16.msra.mxu0 %v937_v4  ;;  %906 = vmatpush3.bf16.msra.mxu1 %v937_v4  ;;  %v117_v42 = vld [vmem:[#allocation2 + $0x70] sm:$0xff]  ;;  %v118_v48 = vld [vmem:[#allocation2 + $0x78] sm:$0xff] }
  0x51   :  { %839 = vmatprep.subr.bf16.mxu0 %v938_v7  ;;  %899 = vmatprep.subr.bf16.mxu1 %v938_v7 }
  0x54   :  { %840 = vmatpush3.bf16.msra.mxu0 %v938_v7  ;;  %907 = vmatpush3.bf16.msra.mxu1 %v938_v7 }
  0x55   :  { %841 = vmatprep.subr.bf16.mxu0 %v939_v8  ;;  %900 = vmatprep.subr.bf16.mxu1 %v939_v8 }
  0x58   :  { %842 = vmatpush3.bf16.msra.mxu0 %v939_v8  ;;  %908 = vmatpush3.bf16.msra.mxu1 %v939_v8 }
  0x59   :  { %843 = vmatprep.subr.bf16.mxu0 %v940_v9  ;;  %901 = vmatprep.subr.bf16.mxu1 %v940_v9 }
  0x5c   :  { %844 = vmatpush3.bf16.msra.mxu0 %v940_v9  ;;  %909 = vmatpush3.bf16.msra.mxu1 %v940_v9 }
  0x5d   :  { %845 = vmatprep.subr.bf16.mxu0 %v941_v10  ;;  %902 = vmatprep.subr.bf16.mxu1 %v941_v10 }
  0x60   :  { %846 = vmatpush3.bf16.msra.mxu0 %v941_v10  ;;  %910 = vmatpush3.bf16.msra.mxu1 %v941_v10 }
  0x63   :  { %848 = vmatmul.mubr.bf16.vlgmr.msra.gmra.mrb[0].mxu0 %v944_v11  ;;  %856 = vmatmul.mubr.bf16.vlgmr.msra.gmra.mrb[0].mxu1 %v945_v12 }
  0x64   :  { %851 = vmatprep.mubr.bf16.mxu0 %v946_v13  ;;  %859 = vmatprep.mubr.bf16.mxu1 %v947_v14 }
  0x6b   :  { %852 = vmatmul.mubr.bf16.gmra.mrb[4].mxu0 %v948_v15  ;;  %860 = vmatmul.mubr.bf16.gmra.mrb[4].mxu1 %v949_v16 }
 0x136   :  { %v849_v21 = vpop.f32.mrb[0].mxu0  ;;  %v857_v22 = vpop.f32.mrb[0].mxu1 }
 0x137   :  { %v346_v25 = vadd.f32 %v849_v21, %v105_v17  ;;  %v354_v26 = vadd.f32 %v857_v22, %v113_v18  ;;  %v281_v27 = vpop.f32.mrb[1].mxu0  ;;  %v313_v28 = vpop.f32.mrb[1].mxu1 }
 0x138   :  { %v344_v31 = vadd.f32 %v281_v27, %v103_v19  ;;  %v352_v32 = vadd.f32 %v313_v28, %v111_v20  ;;  %v850_v33 = vpop.f32.mrb[2].mxu0  ;;  %v858_v34 = vpop.f32.mrb[2].mxu1 }
 0x139   :  { %362 = vst [vmem:[#allocation2 + $0x10] sm:$0xff] %v346_v25  ;;  %370 = vst [vmem:[#allocation2 + $0x50] sm:$0xff] %v354_v26  ;;  %v347_v35 = vadd.f32 %v850_v33, %v106_v23  ;;  %v355_v36 = vadd.f32 %v858_v34, %v114_v24  ;;  %v284_v37 = vpop.f32.mrb[3].mxu0  ;;  %v316_v38 = vpop.f32.mrb[3].mxu1 }
 0x13a   :  { %360 = vst [vmem:[#allocation2] sm:$0xff] %v344_v31  ;;  %368 = vst [vmem:[#allocation2 + $0x40] sm:$0xff] %v352_v32  ;;  %v345_v39 = vadd.f32 %v284_v37, %v104_v29  ;;  %v353_v40 = vadd.f32 %v316_v38, %v112_v30 }
 0x13b   :  { %363 = vst [vmem:[#allocation2 + $0x18] sm:$0xff] %v347_v35  ;;  %371 = vst [vmem:[#allocation2 + $0x58] sm:$0xff] %v355_v36 }
 0x13c   :  { %361 = vst [vmem:[#allocation2 + $0x8] sm:$0xff] %v345_v39  ;;  %369 = vst [vmem:[#allocation2 + $0x48] sm:$0xff] %v353_v40 }
 0x13e   :  { %v853_v45 = vpop.f32.mrb[4].mxu0  ;;  %v861_v46 = vpop.f32.mrb[4].mxu1 }
 0x13f   :  { %v350_v49 = vadd.f32 %v853_v45, %v109_v41  ;;  %v358_v50 = vadd.f32 %v861_v46, %v117_v42  ;;  %v297_v51 = vpop.f32.mrb[5].mxu0  ;;  %v329_v52 = vpop.f32.mrb[5].mxu1 }
 0x140   :  { %v348_v55 = vadd.f32 %v297_v51, %v107_v43  ;;  %v356_v56 = vadd.f32 %v329_v52, %v115_v44  ;;  %v854_v57 = vpop.f32.mrb[6].mxu0  ;;  %v862_v58 = vpop.f32.mrb[6].mxu1 }
 0x141   :  { %366 = vst [vmem:[#allocation2 + $0x30] sm:$0xff] %v350_v49  ;;  %374 = vst [vmem:[#allocation2 + $0x70] sm:$0xff] %v358_v50  ;;  %v351_v59 = vadd.f32 %v854_v57, %v110_v47  ;;  %v359_v60 = vadd.f32 %v862_v58, %v118_v48  ;;  %v300_v61 = vpop.f32.mrb[7].mxu0  ;;  %v332_v62 = vpop.f32.mrb[7].mxu1 }
 0x142   :  { %364 = vst [vmem:[#allocation2 + $0x20] sm:$0xff] %v348_v55  ;;  %372 = vst [vmem:[#allocation2 + $0x60] sm:$0xff] %v356_v56  ;;  %v349_v63 = vadd.f32 %v300_v61, %v108_v53  ;;  %v357_v0 = vadd.f32 %v332_v62, %v116_v54 }
 0x143   :  { %367 = vst [vmem:[#allocation2 + $0x38] sm:$0xff] %v351_v59  ;;  %375 = vst [vmem:[#allocation2 + $0x78] sm:$0xff] %v359_v60 }
 0x144   :  { %365 = vst [vmem:[#allocation2 + $0x28] sm:$0xff] %v349_v63  ;;  %373 = vst [vmem:[#allocation2 + $0x68] sm:$0xff] %v357_v0 }
 0x145 PF:  { %v950_v1 = vld [vmem:[#allocation11] sm:$0xff]   ;;  %v951_v2 = vld [vmem:[#allocation11 + $0x8] sm:$0xff]   ;;  %v952_v3 = vld [vmem:[#allocation11 + $0x10] sm:$0xff]  }
 0x146   :  { %863 = vmatprep.subr.bf16.mxu0 %v950_v1  ;;  %911 = vmatprep.subr.bf16.mxu1 %v950_v1  ;;  %v953_v4 = vld [vmem:[#allocation11 + $0x18] sm:$0xff]   ;;  %v379_v5 = vld [vmem:[#allocation2] sm:$0xff]  ;;  %v380_v6 = vld [vmem:[#allocation2 + $0x8] sm:$0xff] }
 0x147   :  { %864 = vmatpush3.bf16.msra.mxu0 %v950_v1  ;;  %919 = vmatpush3.bf16.msra.mxu1 %v950_v1  ;;  %v395_v8 = vpack.c.bf16 %v380_v6, %v379_v5  ;;  %v954_v11 = vld [vmem:[#allocation11 + $0x20] sm:$0xff]   ;;  %v955_v12 = vld [vmem:[#allocation11 + $0x28] sm:$0xff]   ;;  %v956_v13 = vld [vmem:[#allocation11 + $0x30] sm:$0xff]  }
 0x148   :  { %865 = vmatprep.subr.bf16.mxu0 %v951_v2  ;;  %912 = vmatprep.subr.bf16.mxu1 %v951_v2  ;;  %v387_v7 = vld [vmem:[#allocation2 + $0x40] sm:$0xff]  ;;  %v388_v9 = vld [vmem:[#allocation2 + $0x48] sm:$0xff]  ;;  %v957_v14 = vld [vmem:[#allocation11 + $0x38] sm:$0xff]  }
 0x149   :  { %v399_v10 = vpack.c.bf16 %v388_v9, %v387_v7  ;;  %879 = vmatprep.mubr.bf16.mxu0 %v395_v8  ;;  %v381_v15 = vld [vmem:[#allocation2 + $0x10] sm:$0xff]  ;;  %v382_v16 = vld [vmem:[#allocation2 + $0x18] sm:$0xff]  ;;  %v383_v19 = vld [vmem:[#allocation2 + $0x20] sm:$0xff] }
 0x14a   :  { %v389_v17 = vld [vmem:[#allocation2 + $0x50] sm:$0xff]  ;;  %v390_v18 = vld [vmem:[#allocation2 + $0x58] sm:$0xff]  ;;  %v391_v21 = vld [vmem:[#allocation2 + $0x60] sm:$0xff]  ;;  %v396_v23 = vpack.c.bf16 %v382_v16, %v381_v15 }
 0x14b   :  { %866 = vmatpush3.bf16.msra.mxu0 %v951_v2  ;;  %920 = vmatpush3.bf16.msra.mxu1 %v951_v2  ;;  %v384_v20 = vld [vmem:[#allocation2 + $0x28] sm:$0xff]  ;;  %v400_v24 = vpack.c.bf16 %v390_v18, %v389_v17  ;;  %v385_v27 = vld [vmem:[#allocation2 + $0x30] sm:$0xff]  ;;  %v386_v28 = vld [vmem:[#allocation2 + $0x38] sm:$0xff] }
 0x14c   :  { %867 = vmatprep.subr.bf16.mxu0 %v952_v3  ;;  %913 = vmatprep.subr.bf16.mxu1 %v952_v3  ;;  %v392_v22 = vld [vmem:[#allocation2 + $0x68] sm:$0xff]  ;;  %v397_v25 = vpack.c.bf16 %v384_v20, %v383_v19  ;;  %v393_v29 = vld [vmem:[#allocation2 + $0x70] sm:$0xff]  ;;  %v394_v30 = vld [vmem:[#allocation2 + $0x78] sm:$0xff]  ;;  %v398_v31 = vpack.c.bf16 %v386_v28, %v385_v27 }
 0x14d   :  { %887 = vmatprep.mubr.bf16.mxu1 %v399_v10  ;;  %v401_v26 = vpack.c.bf16 %v392_v22, %v391_v21  ;;  %v402_v32 = vpack.c.bf16 %v394_v30, %v393_v29  ;;  %v710_v33 = vld [vmem:[%s1169_s5] ss:$0 sm:$0xff]  ;;  %s1062_s5 = smov [#allocation12]  }
 0x14e   :  { %s672_s16 = sshll.u32 %s1062_s5, 4  ;;  %s673_s16 = int_to_ptr.vmem [resolvable:$true] %s672_s16 }
 0x14f   :  { %868 = vmatpush3.bf16.msra.mxu0 %v952_v3  ;;  %921 = vmatpush3.bf16.msra.mxu1 %v952_v3  ;;  %s1028_s17 = scalar_lea.vmem %s673_s16, 1024  ;;  %p1033_p6 = scmp.lt.s32.totalorder %s673_s16, %s673_s16 }
 0x150   :  { %869 = vmatprep.subr.bf16.mxu0 %v953_v4  ;;  %914 = vmatprep.subr.bf16.mxu1 %v953_v4  ;;  %p1029_p5 = scmp.ne.s32.totalorder %s673_s16, %s1028_s17  ;;  %p1034_p7 = scmp.lt.s32.totalorder %s1028_s17, %s1028_s17 }
 0x152   :  { %p1035_p8 = por %p1034_p7, %p1033_p6 }
 0x153   :  { %870 = vmatpush3.bf16.msra.mxu0 %v953_v4  ;;  %922 = vmatpush3.bf16.msra.mxu1 %v953_v4 }
 0x154   :  { %871 = vmatprep.subr.bf16.mxu0 %v954_v11  ;;  %915 = vmatprep.subr.bf16.mxu1 %v954_v11  ;;  %p1036_p9 = pnand %p1035_p8, %p1029_p5 }
 0x157   :  { %872 = vmatpush3.bf16.msra.mxu0 %v954_v11  ;;  %923 = vmatpush3.bf16.msra.mxu1 %v954_v11 }
 0x158   :  { %873 = vmatprep.subr.bf16.mxu0 %v955_v12  ;;  %916 = vmatprep.subr.bf16.mxu1 %v955_v12 }
 0x15b   :  { %874 = vmatpush3.bf16.msra.mxu0 %v955_v12  ;;  %924 = vmatpush3.bf16.msra.mxu1 %v955_v12 }
 0x15c   :  { %875 = vmatprep.subr.bf16.mxu0 %v956_v13  ;;  %917 = vmatprep.subr.bf16.mxu1 %v956_v13 }
 0x15f   :  { %876 = vmatpush3.bf16.msra.mxu0 %v956_v13  ;;  %925 = vmatpush3.bf16.msra.mxu1 %v956_v13 }
 0x160   :  { %877 = vmatprep.subr.bf16.mxu0 %v957_v14  ;;  %918 = vmatprep.subr.bf16.mxu1 %v957_v14 }
 0x163   :  { %878 = vmatpush3.bf16.msra.mxu0 %v957_v14  ;;  %926 = vmatpush3.bf16.msra.mxu1 %v957_v14 }
 0x166   :  { %880 = vmatmul.mubr.bf16.vlgmr.msra.gmra.mrb[0].mxu0 %v396_v23  ;;  %888 = vmatmul.mubr.bf16.vlgmr.msra.gmra.mrb[0].mxu1 %v400_v24 }
 0x167   :  { %883 = vmatprep.mubr.bf16.mxu0 %v397_v25  ;;  %891 = vmatprep.mubr.bf16.mxu1 %v401_v26 }
 0x16e   :  { %884 = vmatmul.mubr.bf16.gmra.mrb[4].mxu0 %v398_v31  ;;  %892 = vmatmul.mubr.bf16.gmra.mrb[4].mxu1 %v402_v32 }
 0x239   :  { %v881_v34 = vpop.f32.mrb[0].mxu0  ;;  %v889_v35 = vpop.f32.mrb[0].mxu1 }
 0x23a   :  { %v517_v36 = vadd.f32 %v881_v34, %v710_v33  ;;  %v549_v37 = vadd.f32 %v889_v35, %v710_v33  ;;  %v508_v38 = vpop.f32.mrb[1].mxu0  ;;  %v540_v39 = vpop.f32.mrb[1].mxu1 }
 0x23b   :  { %v509_v40 = vadd.f32 %v710_v33, %v508_v38  ;;  %v541_v41 = vadd.f32 %v710_v33, %v540_v39  ;;  %v882_v42 = vpop.f32.mrb[2].mxu0  ;;  %v890_v43 = vpop.f32.mrb[2].mxu1 }
 0x23c   :  { %v520_v44 = vadd.f32 %v882_v42, %v710_v33  ;;  %v552_v45 = vadd.f32 %v890_v43, %v710_v33  ;;  %v511_v46 = vpop.f32.mrb[3].mxu0  ;;  %v543_v47 = vpop.f32.mrb[3].mxu1  ;;  %v573_v50 = vmax.f32 %v517_v36, 0.0  ;;  %v581_v51 = vmax.f32 %v549_v37, 0.0 }
 0x23d   :  { %v512_v48 = vadd.f32 %v710_v33, %v511_v46  ;;  %v544_v49 = vadd.f32 %v710_v33, %v543_v47  ;;  %v571_v54 = vmax.f32 %v509_v40, 0.0  ;;  %v579_v55 = vmax.f32 %v541_v41, 0.0 }
 0x23e   :  { %v574_v52 = vmax.f32 %v520_v44, 0.0  ;;  %v582_v53 = vmax.f32 %v552_v45, 0.0 }
 0x23f   :  { %v572_v56 = vmax.f32 %v512_v48, 0.0  ;;  %v580_v57 = vmax.f32 %v544_v49, 0.0 }
 0x240   :  { %v760_v58 = vpack.c.bf16 %v574_v52, %v573_v50  ;;  %v780_v59 = vpack.c.bf16 %v582_v53, %v581_v51 }
 0x241   :  { %v755_v60 = vpack.c.bf16 %v572_v56, %v571_v54  ;;  %v775_v61 = vpack.c.bf16 %v580_v57, %v579_v55  ;;  %v885_v62 = vpop.f32.mrb[4].mxu0  ;;  %v893_v63 = vpop.f32.mrb[4].mxu1 }
 0x242   :  { %792 = vst [vmem:[#allocation12 + $0x8] sm:$0xff] %v760_v58   ;;  %796 = vst [vmem:[#allocation12 + $0x28] sm:$0xff] %v780_v59   ;;  %v533_v0 = vadd.f32 %v885_v62, %v710_v33  ;;  %v565_v1 = vadd.f32 %v893_v63, %v710_v33  ;;  %v524_v2 = vpop.f32.mrb[5].mxu0  ;;  %v556_v3 = vpop.f32.mrb[5].mxu1 }
 0x243   :  { %756 = vst [vmem:[#allocation12] sm:$0xff] %v755_v60   ;;  %795 = vst [vmem:[#allocation12 + $0x20] sm:$0xff] %v775_v61   ;;  %v525_v4 = vadd.f32 %v710_v33, %v524_v2  ;;  %v557_v5 = vadd.f32 %v710_v33, %v556_v3  ;;  %v886_v6 = vpop.f32.mrb[6].mxu0  ;;  %v894_v7 = vpop.f32.mrb[6].mxu1 }
 0x244   :  { %v536_v8 = vadd.f32 %v886_v6, %v710_v33  ;;  %v568_v9 = vadd.f32 %v894_v7, %v710_v33  ;;  %v527_v10 = vpop.f32.mrb[7].mxu0  ;;  %v559_v11 = vpop.f32.mrb[7].mxu1  ;;  %v577_v14 = vmax.f32 %v533_v0, 0.0  ;;  %v585_v15 = vmax.f32 %v565_v1, 0.0 }
 0x245   :  { %v528_v12 = vadd.f32 %v710_v33, %v527_v10  ;;  %v560_v13 = vadd.f32 %v710_v33, %v559_v11  ;;  %v575_v18 = vmax.f32 %v525_v4, 0.0  ;;  %v583_v19 = vmax.f32 %v557_v5, 0.0 }
 0x246   :  { %v578_v16 = vmax.f32 %v536_v8, 0.0  ;;  %v586_v17 = vmax.f32 %v568_v9, 0.0 }
 0x247   :  { %v576_v20 = vmax.f32 %v528_v12, 0.0  ;;  %v584_v21 = vmax.f32 %v560_v13, 0.0 }
 0x248   :  { %v770_v22 = vpack.c.bf16 %v578_v16, %v577_v14  ;;  %v790_v23 = vpack.c.bf16 %v586_v17, %v585_v15 }
 0x249   :  { %v765_v24 = vpack.c.bf16 %v576_v20, %v575_v18  ;;  %v785_v25 = vpack.c.bf16 %v584_v21, %v583_v19 }
 0x24a   :  { %794 = vst [vmem:[#allocation12 + $0x18] sm:$0xff] %v770_v22   ;;  %798 = vst [vmem:[#allocation12 + $0x38] sm:$0xff] %v790_v23  }
 0x24b   :  { %793 = vst [vmem:[#allocation12 + $0x10] sm:$0xff] %v765_v24   ;;  %797 = vst [vmem:[#allocation12 + $0x30] sm:$0xff] %v785_v25  }
 0x24c   :  { %1039 = shalt.err (!%p1036_p9)
}
 0x24d   :  { %s1040_s20 = scalar_lea.hbm %s1170_s6, 1024 }
 0x24e   :  { %p1041_p10 = scmp.ne.s32.totalorder %s1170_s6, %s1040_s20  ;;  %p1044_p11 = scmp.lt.u32.totalorder %s1040_s20, %s1170_s6 }
 0x250   :  { %p1046_p12 = pnand %p1044_p11, %p1041_p10 }
 0x252   :  { %1049 = shalt.err (!%p1046_p12)
}
 0x253   :  { %678 = dma.vmem_to_hbm [thread:$0]  %s673_s16, 1024, %s1170_s6, [#allocation8], %s1057_s0, %s1057_s0, %s1058_s15  }
 0x254   :  { %1054 = dma.done.wait [#allocation8], 1024  }
 0x255   :  { %1055 = vsyncadd [#allocation8], 4294966272 }
 0x256   :  { %682 = vsyncpa [#allocation7], 1 }
 0x257   :  { %683 = vsyncpa [#allocation10], 1 }
 0x258   :  { %684 = vsyncpa [#allocation8], 1 }

</bundles_post_ra>
